<compile_context>
chip_gen: v6e
topology: v6e:2x2x1
jax: 0.10.0
libtpu: 0.0.40
codegen_flags: <defaults>
</compile_context>

<pallas_src>
import functools

import jax
import jax.numpy as jnp
from jax.experimental import pallas as pl
from jax.experimental.pallas import tpu as pltpu

# Problem constants (same role as the globals in policy_gradient_player.py).
BOARD_SIZE = 200        # e.g. a 10 x 20 Tetris board, flattened
PIECE_SIZE = 7          # one-hot piece id
ROTATIONS = 4
LR_MOVES = 10
D_IN = BOARD_SIZE + PIECE_SIZE         # 207
HIDDEN = 256
A_OUT = ROTATIONS * LR_MOVES           # 40 real actions
A_PAD = 128                            # lane-dense padded action axis
NEG_BIG = -1e30                        # bias for padded (fake) action columns


def _round_up(x, m):
    return (x + m - 1) // m * m


def _cdiv(a, b):
    return (a + b - 1) // b


def _sigmoid(z):
    # Exact sigmoid via a single EUP tanh (no VALU divide).
    return 0.5 * jnp.tanh(0.5 * z) + 0.5


def _mlp_softmax_kernel(board_ref, piece_ref,
                        w1b_ref, w1p_ref, b1_ref,
                        w2_ref, b2_ref,
                        w3_ref, b3_ref,
                        w4_ref, b4_ref,
                        o_ref):
    """One batch tile (TB rows) of the full MLP + softmax; weights stay VMEM-resident."""
    # Layer 1: board part on the MXU (bf16, f32 accumulation) ...
    xb = board_ref[...].astype(jnp.bfloat16)                              # (TB, 200)
    z = jnp.dot(xb, w1b_ref[...], preferred_element_type=jnp.float32) + b1_ref[...]
    # ... piece part (only 7 features) folded in with broadcast FMAs on the VPU.
    xp = piece_ref[...]                                                   # (TB, 7) f32
    for i in range(PIECE_SIZE):                                           # static unroll
        z = z + xp[:, i:i + 1] * w1p_ref[i:i + 1, :]
    h = _sigmoid(z).astype(jnp.bfloat16)

    z = jnp.dot(h, w2_ref[...], preferred_element_type=jnp.float32) + b2_ref[...]
    h = _sigmoid(z).astype(jnp.bfloat16)
    z = jnp.dot(h, w3_ref[...], preferred_element_type=jnp.float32) + b3_ref[...]
    h = _sigmoid(z).astype(jnp.bfloat16)

    # Lane-dense (128-wide) logits: padded columns get bias -1e30.
    logits = jnp.dot(h, w4_ref[...], preferred_element_type=jnp.float32) + b4_ref[...]

    # Numerically-stable softmax over the action (lane) axis == PyTorch softmax(dim=0).
    # Exact divide so rows sum to 1 to f32 precision; exp of padded columns is exactly 0.
    m = jnp.max(logits, axis=-1, keepdims=True)
    e = jnp.exp(logits - m)
    o_ref[...] = e / jnp.sum(e, axis=-1, keepdims=True)


def init_params(key):
    """Deterministic PyTorch-style Linear init: U(-1/sqrt(fan_in), 1/sqrt(fan_in)), f32."""
    dims = [(D_IN, HIDDEN), (HIDDEN, HIDDEN), (HIDDEN, HIDDEN), (HIDDEN, A_OUT)]
    params = []
    for fan_in, fan_out in dims:
        key, kw, kb = jax.random.split(key, 3)
        bound = 1.0 / jnp.sqrt(fan_in)
        w = jax.random.uniform(kw, (fan_in, fan_out), jnp.float32, -bound, bound)
        b = jax.random.uniform(kb, (1, fan_out), jnp.float32, -bound, bound)
        params.append((w, b))
    return params


def prepare_params(params):
    """Kernel layout: W1 split board/piece, W4/b4 lane-padded to 128, weights bf16."""
    (w1, b1), (w2, b2), (w3, b3), (w4, b4) = params
    w1b = w1[:BOARD_SIZE].astype(jnp.bfloat16)                       # (200, 256) bf16
    w1p = w1[BOARD_SIZE:].astype(jnp.float32)                        # (7, 256)  f32 (VPU path)
    w4p = (jnp.zeros((HIDDEN, A_PAD), jnp.float32)
           .at[:, :A_OUT].set(w4).astype(jnp.bfloat16))              # zero pad columns
    b4p = jnp.full((1, A_PAD), NEG_BIG, jnp.float32).at[:, :A_OUT].set(b4)
    return ((w1b, w1p, b1.astype(jnp.float32)),
            (w2.astype(jnp.bfloat16), b2.astype(jnp.float32)),
            (w3.astype(jnp.bfloat16), b3.astype(jnp.float32)),
            (w4p, b4p))


@functools.partial(jax.jit, static_argnames=("tb",))
def action_probabilities_batched(boards, pieces, kparams, *, tb=512):
    """boards: (B, BOARD_SIZE), pieces: (B, PIECE_SIZE) -> (B, A_OUT) probabilities."""
    B = boards.shape[0]

    # Batch tile: round tiny batches to 16 rows (bf16 sublane packing); for B >= 256 force
    # at least 2 grid tiles so the "parallel" batch axis can feed both v7x TensorCores.
    tb_eff = min(tb, _round_up(B, 16))
    if B >= 256:
        tb_eff = min(tb_eff, _round_up(_cdiv(_round_up(B, 16), 2), 128))
    b_pad = _round_up(B, tb_eff)
    if b_pad != B:
        boards = jnp.pad(boards, ((0, b_pad - B), (0, 0)))
        pieces = jnp.pad(pieces, ((0, b_pad - B), (0, 0)))

    (w1b, w1p, b1), (w2, b2), (w3, b3), (w4, b4) = kparams

    batch_map = lambda i: (i, 0)
    const_map = lambda i: (0, 0)   # weights/biases: same block every step -> VMEM-resident

    out = pl.pallas_call(
        _mlp_softmax_kernel,
        out_shape=jax.ShapeDtypeStruct((b_pad, A_PAD), jnp.float32),
        grid=(b_pad // tb_eff,),
        in_specs=[
            pl.BlockSpec((tb_eff, BOARD_SIZE), batch_map),   # boards (f32, cast in-kernel)
            pl.BlockSpec((tb_eff, PIECE_SIZE), batch_map),   # pieces (f32)
            pl.BlockSpec((BOARD_SIZE, HIDDEN), const_map),   # w1[:200]   bf16
            pl.BlockSpec((PIECE_SIZE, HIDDEN), const_map),   # w1[200:]   f32
            pl.BlockSpec((1, HIDDEN), const_map),            # b1
            pl.BlockSpec((HIDDEN, HIDDEN), const_map),       # w2
            pl.BlockSpec((1, HIDDEN), const_map),            # b2
            pl.BlockSpec((HIDDEN, HIDDEN), const_map),       # w3
            pl.BlockSpec((1, HIDDEN), const_map),            # b3
            pl.BlockSpec((HIDDEN, A_PAD), const_map),        # w4 (zero-padded cols)
            pl.BlockSpec((1, A_PAD), const_map),             # b4 (-1e30 padded cols)
        ],
        out_specs=pl.BlockSpec((tb_eff, A_PAD), batch_map),
        compiler_params=pltpu.CompilerParams(
            dimension_semantics=("parallel",)),              # shard batch tiles across TCs
    )(boards, pieces, w1b, w1p, b1, w2, b2, w3, b3, w4, b4)

    return out[:B, :A_OUT]


def action_probabilities(board, piece, kparams):
    """Single-sample convenience path matching the PyTorch forward (1-D in, 1-D out)."""
    return action_probabilities_batched(board[None, :], piece[None, :], kparams)[0]


def _reference(boards, pieces, kparams):
    """Pure-JAX reference mirroring the kernel's casts (for a tight tolerance check)."""
    (w1b, w1p, b1), (w2, b2), (w3, b3), (w4, b4) = kparams
    f32 = jnp.float32
    xb = boards.astype(jnp.bfloat16).astype(f32)
    z = xb @ w1b.astype(f32) + pieces @ w1p + b1

    def act(z):
        return jax.nn.sigmoid(z).astype(jnp.bfloat16).astype(f32)

    h = act(z)
    h = act(h @ w2.astype(f32) + b2)
    h = act(h @ w3.astype(f32) + b3)
    logits = h @ w4.astype(f32) + b4
    return jax.nn.softmax(logits, axis=-1)[:, :A_OUT]


if __name__ == "__main__":
    key = jax.random.PRNGKey(0)
    key, kb, kp = jax.random.split(key, 3)

    params = init_params(key)
    kparams = prepare_params(params)

    B = 4                                             # small deterministic demo batch
    boards = jax.random.normal(kb, (B, BOARD_SIZE), jnp.float32)
    pieces = jax.random.normal(kp, (B, PIECE_SIZE), jnp.float32)

    probs = jax.block_until_ready(action_probabilities_batched(boards, pieces, kparams))

    assert probs.shape == (B, A_OUT)
    assert bool(jnp.isfinite(probs).all())
    row_sums = jnp.sum(probs, axis=-1)
    assert bool(jnp.all(jnp.abs(row_sums - 1.0) < 1e-3))

    ref = _reference(boards, pieces, kparams)
    assert bool(jnp.max(jnp.abs(probs - ref)) < 2e-3)

    # Single-sample path (matches the original PyTorch forward signature).
    p0 = jax.block_until_ready(action_probabilities(boards[0], pieces[0], kparams))
    assert p0.shape == (A_OUT,)
    assert abs(float(jnp.sum(p0)) - 1.0) < 1e-3

    print("KERNEL_OK")
</pallas_src>

<mosaic_0001>
module attributes {stable_mosaic.version = 11 : i64} {
  func.func @_mlp_softmax_kernel(%arg0: i32, %arg1: memref<16x200xf32, #tpu.memory_space<vmem>>, %arg2: memref<16x7xf32, #tpu.memory_space<vmem>>, %arg3: memref<200x256xbf16, #tpu.memory_space<vmem>>, %arg4: memref<7x256xf32, #tpu.memory_space<vmem>>, %arg5: memref<1x256xf32, #tpu.memory_space<vmem>>, %arg6: memref<256x256xbf16, #tpu.memory_space<vmem>>, %arg7: memref<1x256xf32, #tpu.memory_space<vmem>>, %arg8: memref<256x256xbf16, #tpu.memory_space<vmem>>, %arg9: memref<1x256xf32, #tpu.memory_space<vmem>>, %arg10: memref<256x128xbf16, #tpu.memory_space<vmem>>, %arg11: memref<1x128xf32, #tpu.memory_space<vmem>>, %arg12: memref<16x128xf32, #tpu.memory_space<vmem>>) attributes {dimension_semantics = [#tpu.dimension_semantics<parallel>], iteration_bounds = array<i64: 1>, scalar_prefetch = 0 : i64, scratch_operands = 0 : i64, tpu.core_type = #tpu.core_type<tc>, window_params = [{transform_indices = @transform_0, window_bounds = array<i64: 16, 200>}, {transform_indices = @transform_1, window_bounds = array<i64: 16, 7>}, {pipeline_mode = #tpu.pipeline_mode<synchronous>, transform_indices = @transform_2, window_bounds = array<i64: 200, 256>}, {pipeline_mode = #tpu.pipeline_mode<synchronous>, transform_indices = @transform_3, window_bounds = array<i64: 7, 256>}, {pipeline_mode = #tpu.pipeline_mode<synchronous>, transform_indices = @transform_4, window_bounds = array<i64: 1, 256>}, {pipeline_mode = #tpu.pipeline_mode<synchronous>, transform_indices = @transform_5, window_bounds = array<i64: 256, 256>}, {pipeline_mode = #tpu.pipeline_mode<synchronous>, transform_indices = @transform_6, window_bounds = array<i64: 1, 256>}, {pipeline_mode = #tpu.pipeline_mode<synchronous>, transform_indices = @transform_7, window_bounds = array<i64: 256, 256>}, {pipeline_mode = #tpu.pipeline_mode<synchronous>, transform_indices = @transform_8, window_bounds = array<i64: 1, 256>}, {pipeline_mode = #tpu.pipeline_mode<synchronous>, transform_indices = @transform_9, window_bounds = array<i64: 256, 128>}, {pipeline_mode = #tpu.pipeline_mode<synchronous>, transform_indices = @transform_10, window_bounds = array<i64: 1, 128>}, {transform_indices = @transform_11, window_bounds = array<i64: 16, 128>}]} {
    %c0 = arith.constant 0 : index
    %c0_0 = arith.constant 0 : index
    %0 = vector.load %arg1[%c0, %c0_0] : memref<16x200xf32, #tpu.memory_space<vmem>>, vector<16x200xf32>
    %1 = arith.truncf %0 : vector<16x200xf32> to vector<16x200xbf16>
    %c0_1 = arith.constant 0 : index
    %c0_2 = arith.constant 0 : index
    %2 = vector.load %arg3[%c0_1, %c0_2] : memref<200x256xbf16, #tpu.memory_space<vmem>>, vector<200x256xbf16>
    %cst = arith.constant dense<0.000000e+00> : vector<16x256xf32>
    %3 = tpu.matmul %1, %2, %cst {dimension_numbers = #tpu.dot_dimension_numbers<[1], [0], [0], [1], [0, 0, 1, 1], [], []>} : vector<16x200xbf16>, vector<200x256xbf16>, vector<16x256xf32> -> vector<16x256xf32>
    %c0_3 = arith.constant 0 : index
    %c0_4 = arith.constant 0 : index
    %4 = vector.load %arg5[%c0_3, %c0_4] : memref<1x256xf32, #tpu.memory_space<vmem>>, vector<1x256xf32>
    %5 = vector.broadcast %4 : vector<1x256xf32> to vector<16x256xf32>
    %6 = arith.addf %3, %5 : vector<16x256xf32>
    %c0_5 = arith.constant 0 : index
    %c0_6 = arith.constant 0 : index
    %7 = vector.load %arg2[%c0_5, %c0_6] : memref<16x7xf32, #tpu.memory_space<vmem>>, vector<16x7xf32>
    %8 = vector.extract_strided_slice %7 {offsets = [0, 0], sizes = [16, 1], strides = [1, 1]} : vector<16x7xf32> to vector<16x1xf32>
    %c0_7 = arith.constant 0 : index
    %c0_8 = arith.constant 0 : index
    %9 = vector.load %arg4[%c0_7, %c0_8] : memref<7x256xf32, #tpu.memory_space<vmem>>, vector<1x256xf32>
    %10 = vector.broadcast %8 : vector<16x1xf32> to vector<16x256xf32>
    %11 = vector.broadcast %9 : vector<1x256xf32> to vector<16x256xf32>
    %12 = arith.mulf %10, %11 : vector<16x256xf32>
    %13 = arith.addf %6, %12 : vector<16x256xf32>
    %14 = vector.extract_strided_slice %7 {offsets = [0, 1], sizes = [16, 1], strides = [1, 1]} : vector<16x7xf32> to vector<16x1xf32>
    %c1 = arith.constant 1 : index
    %c0_9 = arith.constant 0 : index
    %15 = vector.load %arg4[%c1, %c0_9] : memref<7x256xf32, #tpu.memory_space<vmem>>, vector<1x256xf32>
    %16 = vector.broadcast %14 : vector<16x1xf32> to vector<16x256xf32>
    %17 = vector.broadcast %15 : vector<1x256xf32> to vector<16x256xf32>
    %18 = arith.mulf %16, %17 : vector<16x256xf32>
    %19 = arith.addf %13, %18 : vector<16x256xf32>
    %20 = vector.extract_strided_slice %7 {offsets = [0, 2], sizes = [16, 1], strides = [1, 1]} : vector<16x7xf32> to vector<16x1xf32>
    %c2 = arith.constant 2 : index
    %c0_10 = arith.constant 0 : index
    %21 = vector.load %arg4[%c2, %c0_10] : memref<7x256xf32, #tpu.memory_space<vmem>>, vector<1x256xf32>
    %22 = vector.broadcast %20 : vector<16x1xf32> to vector<16x256xf32>
    %23 = vector.broadcast %21 : vector<1x256xf32> to vector<16x256xf32>
    %24 = arith.mulf %22, %23 : vector<16x256xf32>
    %25 = arith.addf %19, %24 : vector<16x256xf32>
    %26 = vector.extract_strided_slice %7 {offsets = [0, 3], sizes = [16, 1], strides = [1, 1]} : vector<16x7xf32> to vector<16x1xf32>
    %c3 = arith.constant 3 : index
    %c0_11 = arith.constant 0 : index
    %27 = vector.load %arg4[%c3, %c0_11] : memref<7x256xf32, #tpu.memory_space<vmem>>, vector<1x256xf32>
    %28 = vector.broadcast %26 : vector<16x1xf32> to vector<16x256xf32>
    %29 = vector.broadcast %27 : vector<1x256xf32> to vector<16x256xf32>
    %30 = arith.mulf %28, %29 : vector<16x256xf32>
    %31 = arith.addf %25, %30 : vector<16x256xf32>
    %32 = vector.extract_strided_slice %7 {offsets = [0, 4], sizes = [16, 1], strides = [1, 1]} : vector<16x7xf32> to vector<16x1xf32>
    %c4 = arith.constant 4 : index
    %c0_12 = arith.constant 0 : index
    %33 = vector.load %arg4[%c4, %c0_12] : memref<7x256xf32, #tpu.memory_space<vmem>>, vector<1x256xf32>
    %34 = vector.broadcast %32 : vector<16x1xf32> to vector<16x256xf32>
    %35 = vector.broadcast %33 : vector<1x256xf32> to vector<16x256xf32>
    %36 = arith.mulf %34, %35 : vector<16x256xf32>
    %37 = arith.addf %31, %36 : vector<16x256xf32>
    %38 = vector.extract_strided_slice %7 {offsets = [0, 5], sizes = [16, 1], strides = [1, 1]} : vector<16x7xf32> to vector<16x1xf32>
    %c5 = arith.constant 5 : index
    %c0_13 = arith.constant 0 : index
    %39 = vector.load %arg4[%c5, %c0_13] : memref<7x256xf32, #tpu.memory_space<vmem>>, vector<1x256xf32>
    %40 = vector.broadcast %38 : vector<16x1xf32> to vector<16x256xf32>
    %41 = vector.broadcast %39 : vector<1x256xf32> to vector<16x256xf32>
    %42 = arith.mulf %40, %41 : vector<16x256xf32>
    %43 = arith.addf %37, %42 : vector<16x256xf32>
    %44 = vector.extract_strided_slice %7 {offsets = [0, 6], sizes = [16, 1], strides = [1, 1]} : vector<16x7xf32> to vector<16x1xf32>
    %c6 = arith.constant 6 : index
    %c0_14 = arith.constant 0 : index
    %45 = vector.load %arg4[%c6, %c0_14] : memref<7x256xf32, #tpu.memory_space<vmem>>, vector<1x256xf32>
    %46 = vector.broadcast %44 : vector<16x1xf32> to vector<16x256xf32>
    %47 = vector.broadcast %45 : vector<1x256xf32> to vector<16x256xf32>
    %48 = arith.mulf %46, %47 : vector<16x256xf32>
    %49 = arith.addf %43, %48 : vector<16x256xf32>
    %cst_15 = arith.constant 5.000000e-01 : f32
    %50 = vector.broadcast %cst_15 : f32 to vector<16x256xf32>
    %51 = arith.mulf %50, %49 : vector<16x256xf32>
    %52 = math.tanh %51 : vector<16x256xf32>
    %cst_16 = arith.constant 5.000000e-01 : f32
    %53 = vector.broadcast %cst_16 : f32 to vector<16x256xf32>
    %54 = arith.mulf %53, %52 : vector<16x256xf32>
    %cst_17 = arith.constant 5.000000e-01 : f32
    %55 = vector.broadcast %cst_17 : f32 to vector<16x256xf32>
    %56 = arith.addf %54, %55 : vector<16x256xf32>
    %57 = arith.truncf %56 : vector<16x256xf32> to vector<16x256xbf16>
    %c0_18 = arith.constant 0 : index
    %c0_19 = arith.constant 0 : index
    %58 = vector.load %arg6[%c0_18, %c0_19] : memref<256x256xbf16, #tpu.memory_space<vmem>>, vector<256x256xbf16>
    %cst_20 = arith.constant dense<0.000000e+00> : vector<16x256xf32>
    %59 = tpu.matmul %57, %58, %cst_20 {dimension_numbers = #tpu.dot_dimension_numbers<[1], [0], [0], [1], [0, 0, 1, 1], [], []>} : vector<16x256xbf16>, vector<256x256xbf16>, vector<16x256xf32> -> vector<16x256xf32>
    %c0_21 = arith.constant 0 : index
    %c0_22 = arith.constant 0 : index
    %60 = vector.load %arg7[%c0_21, %c0_22] : memref<1x256xf32, #tpu.memory_space<vmem>>, vector<1x256xf32>
    %61 = vector.broadcast %60 : vector<1x256xf32> to vector<16x256xf32>
    %62 = arith.addf %59, %61 : vector<16x256xf32>
    %cst_23 = arith.constant 5.000000e-01 : f32
    %63 = vector.broadcast %cst_23 : f32 to vector<16x256xf32>
    %64 = arith.mulf %63, %62 : vector<16x256xf32>
    %65 = math.tanh %64 : vector<16x256xf32>
    %cst_24 = arith.constant 5.000000e-01 : f32
    %66 = vector.broadcast %cst_24 : f32 to vector<16x256xf32>
    %67 = arith.mulf %66, %65 : vector<16x256xf32>
    %cst_25 = arith.constant 5.000000e-01 : f32
    %68 = vector.broadcast %cst_25 : f32 to vector<16x256xf32>
    %69 = arith.addf %67, %68 : vector<16x256xf32>
    %70 = arith.truncf %69 : vector<16x256xf32> to vector<16x256xbf16>
    %c0_26 = arith.constant 0 : index
    %c0_27 = arith.constant 0 : index
    %71 = vector.load %arg8[%c0_26, %c0_27] : memref<256x256xbf16, #tpu.memory_space<vmem>>, vector<256x256xbf16>
    %cst_28 = arith.constant dense<0.000000e+00> : vector<16x256xf32>
    %72 = tpu.matmul %70, %71, %cst_28 {dimension_numbers = #tpu.dot_dimension_numbers<[1], [0], [0], [1], [0, 0, 1, 1], [], []>} : vector<16x256xbf16>, vector<256x256xbf16>, vector<16x256xf32> -> vector<16x256xf32>
    %c0_29 = arith.constant 0 : index
    %c0_30 = arith.constant 0 : index
    %73 = vector.load %arg9[%c0_29, %c0_30] : memref<1x256xf32, #tpu.memory_space<vmem>>, vector<1x256xf32>
    %74 = vector.broadcast %73 : vector<1x256xf32> to vector<16x256xf32>
    %75 = arith.addf %72, %74 : vector<16x256xf32>
    %cst_31 = arith.constant 5.000000e-01 : f32
    %76 = vector.broadcast %cst_31 : f32 to vector<16x256xf32>
    %77 = arith.mulf %76, %75 : vector<16x256xf32>
    %78 = math.tanh %77 : vector<16x256xf32>
    %cst_32 = arith.constant 5.000000e-01 : f32
    %79 = vector.broadcast %cst_32 : f32 to vector<16x256xf32>
    %80 = arith.mulf %79, %78 : vector<16x256xf32>
    %cst_33 = arith.constant 5.000000e-01 : f32
    %81 = vector.broadcast %cst_33 : f32 to vector<16x256xf32>
    %82 = arith.addf %80, %81 : vector<16x256xf32>
    %83 = arith.truncf %82 : vector<16x256xf32> to vector<16x256xbf16>
    %c0_34 = arith.constant 0 : index
    %c0_35 = arith.constant 0 : index
    %84 = vector.load %arg10[%c0_34, %c0_35] : memref<256x128xbf16, #tpu.memory_space<vmem>>, vector<256x128xbf16>
    %cst_36 = arith.constant dense<0.000000e+00> : vector<16x128xf32>
    %85 = tpu.matmul %83, %84, %cst_36 {dimension_numbers = #tpu.dot_dimension_numbers<[1], [0], [0], [1], [0, 0, 1, 1], [], []>} : vector<16x256xbf16>, vector<256x128xbf16>, vector<16x128xf32> -> vector<16x128xf32>
    %c0_37 = arith.constant 0 : index
    %c0_38 = arith.constant 0 : index
    %86 = vector.load %arg11[%c0_37, %c0_38] : memref<1x128xf32, #tpu.memory_space<vmem>>, vector<1x128xf32>
    %87 = vector.broadcast %86 : vector<1x128xf32> to vector<16x128xf32>
    %88 = arith.addf %85, %87 : vector<16x128xf32>
    %cst_39 = arith.constant dense<0xFF800000> : vector<16xf32>
    %89 = vector.multi_reduction <maximumf>, %88, %cst_39 [1] : vector<16x128xf32> to vector<16xf32>
    %90 = vector.shape_cast %89 : vector<16xf32> to vector<16x1xf32>
    %91 = vector.broadcast %90 : vector<16x1xf32> to vector<16x128xf32>
    %92 = arith.subf %88, %91 : vector<16x128xf32>
    %93 = math.exp %92 : vector<16x128xf32>
    %cst_40 = arith.constant dense<0.000000e+00> : vector<16xf32>
    %94 = vector.multi_reduction <add>, %93, %cst_40 [1] : vector<16x128xf32> to vector<16xf32>
    %95 = vector.shape_cast %94 : vector<16xf32> to vector<16x1xf32>
    %96 = vector.broadcast %95 : vector<16x1xf32> to vector<16x128xf32>
    %97 = arith.divf %93, %96 : vector<16x128xf32>
    %c0_41 = arith.constant 0 : index
    %c0_42 = arith.constant 0 : index
    %98 = vector.load %arg12[%c0_41, %c0_42] : memref<16x128xf32, #tpu.memory_space<vmem>>, vector<16x128xf32>
    tpu.vector_store %arg12[%c0_41, %c0_42], %97 {strides = array<i32>} : memref<16x128xf32, #tpu.memory_space<vmem>>, vector<16x128xf32>,
    return
  }
  func.func @transform_0(%arg0: i32) -> (i32, i32) {
    %c0_i32 = arith.constant 0 : i32
    %c0_i32_0 = arith.constant 0 : i32
    return %arg0, %c0_i32 : i32, i32
  }
  func.func @transform_1(%arg0: i32) -> (i32, i32) {
    %c0_i32 = arith.constant 0 : i32
    %c0_i32_0 = arith.constant 0 : i32
    return %arg0, %c0_i32 : i32, i32
  }
  func.func @transform_2(%arg0: i32) -> (i32, i32) {
    %c0_i32 = arith.constant 0 : i32
    %c0_i32_0 = arith.constant 0 : i32
    %c0_i32_1 = arith.constant 0 : i32
    return %c0_i32, %c0_i32_0 : i32, i32
  }
  func.func @transform_3(%arg0: i32) -> (i32, i32) {
    %c0_i32 = arith.constant 0 : i32
    %c0_i32_0 = arith.constant 0 : i32
    %c0_i32_1 = arith.constant 0 : i32
    return %c0_i32, %c0_i32_0 : i32, i32
  }
  func.func @transform_4(%arg0: i32) -> (i32, i32) {
    %c0_i32 = arith.constant 0 : i32
    %c0_i32_0 = arith.constant 0 : i32
    %c0_i32_1 = arith.constant 0 : i32
    return %c0_i32, %c0_i32_0 : i32, i32
  }
  func.func @transform_5(%arg0: i32) -> (i32, i32) {
    %c0_i32 = arith.constant 0 : i32
    %c0_i32_0 = arith.constant 0 : i32
    %c0_i32_1 = arith.constant 0 : i32
    return %c0_i32, %c0_i32_0 : i32, i32
  }
  func.func @transform_6(%arg0: i32) -> (i32, i32) {
    %c0_i32 = arith.constant 0 : i32
    %c0_i32_0 = arith.constant 0 : i32
    %c0_i32_1 = arith.constant 0 : i32
    return %c0_i32, %c0_i32_0 : i32, i32
  }
  func.func @transform_7(%arg0: i32) -> (i32, i32) {
    %c0_i32 = arith.constant 0 : i32
    %c0_i32_0 = arith.constant 0 : i32
    %c0_i32_1 = arith.constant 0 : i32
    return %c0_i32, %c0_i32_0 : i32, i32
  }
  func.func @transform_8(%arg0: i32) -> (i32, i32) {
    %c0_i32 = arith.constant 0 : i32
    %c0_i32_0 = arith.constant 0 : i32
    %c0_i32_1 = arith.constant 0 : i32
    return %c0_i32, %c0_i32_0 : i32, i32
  }
  func.func @transform_9(%arg0: i32) -> (i32, i32) {
    %c0_i32 = arith.constant 0 : i32
    %c0_i32_0 = arith.constant 0 : i32
    %c0_i32_1 = arith.constant 0 : i32
    return %c0_i32, %c0_i32_0 : i32, i32
  }
  func.func @transform_10(%arg0: i32) -> (i32, i32) {
    %c0_i32 = arith.constant 0 : i32
    %c0_i32_0 = arith.constant 0 : i32
    %c0_i32_1 = arith.constant 0 : i32
    return %c0_i32, %c0_i32_0 : i32, i32
  }
  func.func @transform_11(%arg0: i32) -> (i32, i32) {
    %c0_i32 = arith.constant 0 : i32
    %c0_i32_0 = arith.constant 0 : i32
    return %arg0, %c0_i32 : i32, i32
  }
}

</mosaic_0001>

<bundles_post_ra>
// kernel: action_probabilities_batched.1
= control target key start
LH: loop header
LB: loop body
LE: loop exit
PB: predicated region body
PF: predicated region fallthrough
CT: control target
= control target key end

     0   :  { %16 = vsyncpa [#allocation3], 0  ;;  %s1910_s0 = inlined_call_operand.vmem [shape: f32[16,200], index: 0, kind: input, shape index: {}]   ;;  %s1911_s1 = inlined_call_operand.vmem [shape: f32[16,7], index: 1, kind: input, shape index: {}]   ;;  %s1912_s2 = inlined_call_operand.hbm [shape: bf16[200,256], index: 2, kind: input, shape index: {}]   ;;  %s1913_s3 = inlined_call_operand.vmem [shape: f32[7,256], index: 3, kind: input, shape index: {}]   ;;  %s1914_s4 = inlined_call_operand.vmem [shape: f32[1,256], index: 4, kind: input, shape index: {}]   ;;  %s1915_s5 = inlined_call_operand.hbm [shape: bf16[256,256], index: 5, kind: input, shape index: {}]   ;;  %s1916_s6 = inlined_call_operand.vmem [shape: f32[1,256], index: 6, kind: input, shape index: {}]   ;;  %s1917_s7 = inlined_call_operand.hbm [shape: bf16[256,256], index: 7, kind: input, shape index: {}]   ;;  %s1918_s8 = inlined_call_operand.vmem [shape: f32[1,256], index: 8, kind: input, shape index: {}]   ;;  %s1919_s9 = inlined_call_operand.hbm [shape: bf16[256,128], index: 9, kind: input, shape index: {}]   ;;  %s1920_s10 = inlined_call_operand.vmem [shape: f32[1,128], index: 10, kind: input, shape index: {}]   ;;  %s1921_s11 = inlined_call_operand.vmem [shape: f32[16,128], index: 11, kind: output, shape index: {}]  }
   0x1   :  { %17 = vsyncpa [#allocation5], 0 }
   0x2   :  { %18 = vsyncpa [#allocation8], 0  ;;  %s1704_s17 = smov [#allocation4]   ;;  %s1705_s19 = smov [#allocation2]  }
   0x3   :  { %s44_s18 = sshll.u32 %s1704_s17, 4  ;;  %s28_s20 = sshll.u32 %s1705_s19, 4  ;;  %s45_s18 = int_to_ptr.vmem [resolvable:$true] %s44_s18  ;;  %s29_s20 = int_to_ptr.vmem [resolvable:$true] %s28_s20 }
   0x4   :  { %s1626_s21 = scalar_lea.vmem %s45_s18, 4096  ;;  %p1631_p1 = scmp.lt.s32.totalorder %s45_s18, %s45_s18 }
   0x5   :  { %p1627_p0 = scmp.ne.s32.totalorder %s45_s18, %s1626_s21  ;;  %p1632_p2 = scmp.lt.s32.totalorder %s1626_s21, %s1626_s21 }
   0x7   :  { %p1633_p3 = por %p1632_p2, %p1631_p1 }
   0x9   :  { %p1634_p4 = pnand %p1633_p3, %p1627_p0 }
   0xb   :  { %1637 = shalt.err (!%p1634_p4)
}
   0xc   :  { %s1706_s22 = smov 128   ;;  %s1707_s23 = smov 8  }
   0xd   :  { %50 = dma.hbm_to_vmem [thread:$0]  %s1915_s5, 4096, %s45_s18, [#allocation5], %s1706_s22, %s1706_s22, %s1707_s23  }
   0xe   :  { %s1646_s26 = scalar_lea.vmem %s29_s20, 3200  ;;  %p1651_p6 = scmp.lt.s32.totalorder %s29_s20, %s29_s20 }
   0xf   :  { %p1647_p5 = scmp.ne.s32.totalorder %s29_s20, %s1646_s26  ;;  %p1652_p7 = scmp.lt.s32.totalorder %s1646_s26, %s1646_s26 }
  0x11   :  { %p1653_p8 = por %p1652_p7, %p1651_p6 }
  0x13   :  { %p1654_p9 = pnand %p1653_p8, %p1647_p5 }
  0x15   :  { %1657 = shalt.err (!%p1654_p9)
}
  0x16   :  { %34 = dma.hbm_to_vmem [thread:$0]  %s1912_s2, 3200, %s29_s20, [#allocation3], %s1706_s22, %s1706_s22, %s1707_s23  }
  0x17   :  { %s1708_s29 = smov [#allocation6]   ;;  %s1709_s12 = smov [#allocation7]  }
  0x18   :  { %s58_s30 = sshll.u32 %s1708_s29, 4  ;;  %s72_s13 = sshll.u32 %s1709_s12, 4  ;;  %s59_s30 = int_to_ptr.vmem [resolvable:$true] %s58_s30  ;;  %s73_s13 = int_to_ptr.vmem [resolvable:$true] %s72_s13 }
  0x19   :  { %s1666_s14 = scalar_lea.vmem %s59_s30, 4096  ;;  %p1671_p11 = scmp.lt.s32.totalorder %s59_s30, %s59_s30 }
  0x1a   :  { %p1667_p10 = scmp.ne.s32.totalorder %s59_s30, %s1666_s14  ;;  %p1672_p12 = scmp.lt.s32.totalorder %s1666_s14, %s1666_s14 }
  0x1c   :  { %p1673_p13 = por %p1672_p12, %p1671_p11 }
  0x1e   :  { %p1674_p0 = pnand %p1673_p13, %p1667_p10 }
  0x20   :  { %1677 = shalt.err (!%p1674_p0)
}
  0x21   :  { %64 = dma.hbm_to_vmem [thread:$0]  %s1917_s7, 4096, %s59_s30, [#allocation5], %s1706_s22, %s1706_s22, %s1707_s23  }
  0x22   :  { %s1686_s16 = scalar_lea.vmem %s73_s13, 2048  ;;  %p1691_p2 = scmp.lt.s32.totalorder %s73_s13, %s73_s13 }
  0x23   :  { %p1687_p1 = scmp.ne.s32.totalorder %s73_s13, %s1686_s16  ;;  %p1692_p3 = scmp.lt.s32.totalorder %s1686_s16, %s1686_s16 }
  0x25   :  { %p1693_p4 = por %p1692_p3, %p1691_p2 }
  0x27   :  { %p1694_p5 = pnand %p1693_p4, %p1687_p1 }
  0x29   :  { %1697 = shalt.err (!%p1694_p5)
}
  0x2a   :  { %s1710_s2 = smov 64   ;;  %s1711_s17 = smov 4  }
  0x2b   :  { %78 = dma.hbm_to_vmem [thread:$0]  %s1919_s9, 2048, %s73_s13, [#allocation8], %s1710_s2, %s1710_s2, %s1711_s17  }
  0x2c   :  { %1698 = dma.done.wait [#allocation3], 3200  }
  0x2d   :  { %1699 = vsyncadd [#allocation3], 4294964096 }
  0x2e   :  { %1700 = dma.done.wait [#allocation5], 8192  }
  0x2f   :  { %1701 = vsyncadd [#allocation5], 4294959104 }
  0x30   :  { %1702 = dma.done.wait [#allocation8], 2048  }
  0x31   :  { %1703 = vsyncadd [#allocation8], 4294965248  ;;  %v1712_v0 = vmov 1   ;;  %v1713_v1 = vmov 0   ;;  %v1436_v2 = vld [vmem:[#allocation2 + $0x74] ss:$8 sps:$4 sm:$0xff]  }
  0x32   :  { %1426 = vset.pattern.permute.xlu1 %v1712_v0  ;;  %1425 = vset.pattern.permute.xlu0 %v1713_v1  ;;  %v1438_v3 = vld [vmem:[#allocation2 + $0x70] ss:$8 sps:$4 sm:$0xff]   ;;  %v1439_v4 = vld [vmem:[#allocation2 + $0x64] ss:$8 sps:$4 sm:$0xff]   ;;  %v1441_v5 = vld [vmem:[#allocation2 + $0x60] ss:$8 sps:$4 sm:$0xff]  }
  0x33   :  { %273 = vmatprep.subr.bf16.mxu0 %v1436_v2  ;;  %v1442_v6 = vld [vmem:[#allocation2 + $0x54] ss:$8 sps:$4 sm:$0xff]   ;;  %v1444_v7 = vld [vmem:[#allocation2 + $0x50] ss:$8 sps:$4 sm:$0xff]   ;;  %v1445_v8 = vld [vmem:[#allocation2 + $0x44] ss:$8 sps:$4 sm:$0xff]  }
  0x34   :  { %274 = vmatpush1.bf16.msra.mxu0 %v1438_v3  ;;  %v1447_v9 = vld [vmem:[#allocation2 + $0x40] ss:$8 sps:$4 sm:$0xff]   ;;  %v1448_v10 = vld [vmem:[#allocation2 + $0x34] ss:$8 sps:$4 sm:$0xff]   ;;  %v1450_v11 = vld [vmem:[#allocation2 + $0x30] ss:$8 sps:$4 sm:$0xff]  }
  0x35   :  { %275 = vmatprep.subr.bf16.mxu0 %v1439_v4  ;;  %v1451_v12 = vld [vmem:[#allocation2 + $0x24] ss:$8 sps:$4 sm:$0xff]   ;;  %v97_v14 = vld [vmem:[%s1910_s0 + $0x18] sm:$0xff]  ;;  %vm262_vm0 = vcmask 588800   ;;  %v1453_v15 = vld [vmem:[#allocation2 + $0x20] ss:$8 sps:$4 sm:$0xff]  }
  0x36   :  { %v95_v13 = vld [vmem:[%s1910_s0 + $0x8] sm:$0xff]  ;;  %v1800_v17 = vld [vmem:[%s1911_s1] sm:$0xff]  ;;  %v1454_v18 = vld [vmem:[#allocation2 + $0x14] ss:$8 sps:$4 sm:$0xff]   ;;  %v1714_v29 = vmov 2   ;;  %vm266_vm1 = vcmask 1043456  }
  0x37   :  { %v99_v16 = vpack.c.bf16 %v97_v14, %v95_v13  ;;  %351 = vperm.xlu1 %1426, %v1800_v17   ;;  %v1806_v19 = vld [vmem:[%s1911_s1 + $0x8] sm:$0xff]  ;;  %321 = vperm.xlu0 %1425, %v1800_v17   ;;  %v1474_v20 = vld [vmem:[#allocation4 + $0x74] ss:$8 sps:$4 sm:$0xff]   ;;  %v1476_v21 = vld [vmem:[#allocation4 + $0x70] ss:$8 sps:$4 sm:$0xff]   ;;  %v1715_v35 = vmov 3  }
  0x38   :  { %276 = vmatpush1.bf16.msra.mxu0 %v1441_v5  ;;  %v1477_v22 = vld [vmem:[#allocation4 + $0x64] ss:$8 sps:$4 sm:$0xff]   ;;  %744 = vmatprep.subr.bf16.mxu1 %v1474_v20  ;;  %v1456_v23 = vld [vmem:[#allocation2 + $0x10] ss:$8 sps:$4 sm:$0xff]   ;;  %v124_v25 = vld [vmem:[#allocation2 + $0xc0] sm:$0xff]  ;;  %v1716_v42 = vmov 4  }
  0x39   :  { %277 = vmatprep.subr.bf16.mxu0 %v1442_v6  ;;  %1300 = vmatprep.mubr.msk.bf16.mxu0 %vm262_vm0, %v99_v16  ;;  %v1457_v24 = vld [vmem:[#allocation2 + $0x4] ss:$8 sps:$4 sm:$0xff]   ;;  %v1479_v26 = vld [vmem:[#allocation4 + $0x60] ss:$8 sps:$4 sm:$0xff]   ;;  %v1298_v30 = vcombine.high %v124_v25, %v124_v25  ;;  %v1297_v31 = vcombine.low %v124_v25, %v124_v25  ;;  %v1482_v32 = vld [vmem:[#allocation4 + $0x50] ss:$8 sps:$4 sm:$0xff]  }
  0x3a   :  { %745 = vmatpush1.bf16.msra.mxu1 %v1476_v21  ;;  %v1459_v27 = vld [vmem:[#allocation2] ss:$8 sps:$4 sm:$0xff]   ;;  %v1480_v28 = vld [vmem:[#allocation4 + $0x54] ss:$8 sps:$4 sm:$0xff]   ;;  %v1483_v33 = vld [vmem:[#allocation4 + $0x44] ss:$8 sps:$4 sm:$0xff]  }
  0x3b   :  { %355 = vperm.xlu1 %1426, %v1806_v19   ;;  %326 = vperm.xlu0 %1425, %v1806_v19   ;;  %v1462_v34 = vld [vmem:[#allocation2 + $0xb4] ss:$8 sps:$4 sm:$0xff]   ;;  %v1485_v36 = vld [vmem:[#allocation4 + $0x40] ss:$8 sps:$4 sm:$0xff]   ;;  %v268_v37 = vsel %vm266_vm1, %v1297_v31, 0  ;;  %v1717_v45 = vmov 5  }
  0x3c   :  { %278 = vmatpush1.bf16.msra.mxu0 %v1444_v7  ;;  %746 = vmatprep.subr.bf16.mxu1 %v1477_v22  ;;  %v1464_v38 = vld [vmem:[#allocation2 + $0xb0] ss:$8 sps:$4 sm:$0xff]   ;;  %v1486_v39 = vld [vmem:[#allocation4 + $0x34] ss:$8 sps:$4 sm:$0xff]   ;;  %v1467_v43 = vld [vmem:[#allocation2 + $0xa0] ss:$8 sps:$4 sm:$0xff]  }
  0x3d   :  { %279 = vmatprep.subr.bf16.mxu0 %v1445_v8  ;;  %v1465_v40 = vld [vmem:[#allocation2 + $0xa4] ss:$8 sps:$4 sm:$0xff]   ;;  %v1488_v41 = vld [vmem:[#allocation4 + $0x30] ss:$8 sps:$4 sm:$0xff]   ;;  %v1468_v44 = vld [vmem:[#allocation2 + $0x94] ss:$8 sps:$4 sm:$0xff]  }
  0x3e   :  { %747 = vmatpush1.bf16.msra.mxu1 %v1479_v26  ;;  %v1470_v46 = vld [vmem:[#allocation2 + $0x90] ss:$8 sps:$4 sm:$0xff]   ;;  %v1471_v47 = vld [vmem:[#allocation2 + $0x84] ss:$8 sps:$4 sm:$0xff]   ;;  %v1718_v48 = vmov 6  }
  0x3f   :  { %1428 = vset.pattern.permute.xlu1 %v1714_v29  ;;  %1427 = vset.pattern.permute.xlu0 %v1714_v29  ;;  %v1473_v49 = vld [vmem:[#allocation2 + $0x80] ss:$8 sps:$4 sm:$0xff]   ;;  %v96_v51 = vld [vmem:[%s1910_s0 + $0x10] sm:$0xff]  ;;  %v1492_v55 = vld [vmem:[#allocation4 + $0x14] ss:$8 sps:$4 sm:$0xff]  }
  0x40   :  { %280 = vmatpush1.bf16.msra.mxu0 %v1447_v9  ;;  %384 = vperm.xlu1 %1428, %v1806_v19   ;;  %v94_v50 = vld [vmem:[%s1910_s0] sm:$0xff]  ;;  %v1489_v53 = vld [vmem:[#allocation4 + $0x24] ss:$8 sps:$4 sm:$0xff]   ;;  %v1491_v54 = vld [vmem:[#allocation4 + $0x20] ss:$8 sps:$4 sm:$0xff]  }
  0x41   :  { %281 = vmatprep.subr.bf16.mxu0 %v1448_v10  ;;  %380 = vperm.xlu0 %1427, %v1800_v17   ;;  %v98_v52 = vpack.c.bf16 %v96_v51, %v94_v50  ;;  %v1494_v56 = vld [vmem:[#allocation4 + $0x10] ss:$8 sps:$4 sm:$0xff]   ;;  %v1495_v57 = vld [vmem:[#allocation4 + $0x4] ss:$8 sps:$4 sm:$0xff]   ;;  %v1497_v58 = vld [vmem:[#allocation4] ss:$8 sps:$4 sm:$0xff]  }
  0x42   :  { %748 = vmatprep.subr.bf16.mxu1 %v1480_v28  ;;  %v1498_v59 = vld [vmem:[#allocation4 + $0xf4] ss:$8 sps:$4 sm:$0xff]   ;;  %v1500_v60 = vld [vmem:[#allocation4 + $0xf0] ss:$8 sps:$4 sm:$0xff]   ;;  %v1501_v61 = vld [vmem:[#allocation4 + $0xe4] ss:$8 sps:$4 sm:$0xff]  }
  0x43   :  { %749 = vmatpush1.bf16.msra.mxu1 %v1482_v32  ;;  %v1503_v62 = vld [vmem:[#allocation4 + $0xe0] ss:$8 sps:$4 sm:$0xff]   ;;  %v1504_v63 = vld [vmem:[#allocation4 + $0xd4] ss:$8 sps:$4 sm:$0xff]   ;;  %v1506_v0 = vld [vmem:[#allocation4 + $0xd0] ss:$8 sps:$4 sm:$0xff]   ;;  %v127_v32 = vlaneseq }
  0x44   :  { %282 = vmatpush1.bf16.msra.mxu0 %v1450_v11  ;;  %1429 = vset.pattern.permute.xlu1 %v1715_v35  ;;  %v1507_v1 = vld [vmem:[#allocation4 + $0xc4] ss:$8 sps:$4 sm:$0xff]   ;;  %v1509_v2 = vld [vmem:[#allocation4 + $0xc0] ss:$8 sps:$4 sm:$0xff]   ;;  %v1510_v3 = vld [vmem:[#allocation4 + $0xb4] ss:$8 sps:$4 sm:$0xff]  }
  0x45   :  { %283 = vmatprep.subr.bf16.mxu0 %v1451_v12  ;;  %409 = vperm.xlu1 %1429, %v1800_v17   ;;  %v1512_v4 = vld [vmem:[#allocation4 + $0xb0] ss:$8 sps:$4 sm:$0xff]   ;;  %v1513_v5 = vld [vmem:[#allocation4 + $0xa4] ss:$8 sps:$4 sm:$0xff]   ;;  %v1515_v6 = vld [vmem:[#allocation4 + $0xa0] ss:$8 sps:$4 sm:$0xff]  }
  0x46   :  { %1430 = vset.pattern.permute.xlu0 %v1715_v35  ;;  %750 = vmatprep.subr.bf16.mxu1 %v1483_v33  ;;  %v1516_v7 = vld [vmem:[#allocation4 + $0x94] ss:$8 sps:$4 sm:$0xff]   ;;  %v1518_v8 = vld [vmem:[#allocation4 + $0x90] ss:$8 sps:$4 sm:$0xff]   ;;  %v1519_v9 = vld [vmem:[#allocation4 + $0x84] ss:$8 sps:$4 sm:$0xff]  }
  0x47   :  { %413 = vperm.xlu0 %1430, %v1806_v19   ;;  %751 = vmatpush1.bf16.msra.mxu1 %v1485_v36  ;;  %v1521_v10 = vld [vmem:[#allocation4 + $0x80] ss:$8 sps:$4 sm:$0xff]   ;;  %v1522_v11 = vld [vmem:[#allocation6 + $0x70] ss:$8 sps:$4 sm:$0xff]   ;;  %v1524_v12 = vld [vmem:[#allocation6 + $0x74] ss:$8 sps:$4 sm:$0xff]  }
  0x48   :  { %284 = vmatpush1.bf16.msra.mxu0 %v1453_v15  ;;  %752 = vmatprep.subr.bf16.mxu1 %v1486_v39  ;;  %v1527_v13 = vld [vmem:[#allocation6 + $0x64] ss:$8 sps:$4 sm:$0xff]   ;;  %v1525_v14 = vld [vmem:[#allocation6 + $0x60] ss:$8 sps:$4 sm:$0xff]   ;;  %v1530_v15 = vld [vmem:[#allocation6 + $0x54] ss:$8 sps:$4 sm:$0xff]  }
  0x49   :  { %285 = vmatprep.subr.bf16.mxu0 %v1454_v18  ;;  %1431 = vset.pattern.permute.xlu1 %v1716_v42  ;;  %v1528_v16 = vld [vmem:[#allocation6 + $0x50] ss:$8 sps:$4 sm:$0xff]   ;;  %v1531_v18 = vld [vmem:[#allocation6 + $0x40] ss:$8 sps:$4 sm:$0xff]   ;;  %v1539_v21 = vld [vmem:[#allocation6 + $0x24] ss:$8 sps:$4 sm:$0xff]  }
  0x4a   :  { %438 = vperm.xlu1 %1431, %v1800_v17   ;;  %v1534_v20 = vld [vmem:[#allocation6 + $0x30] ss:$8 sps:$4 sm:$0xff]   ;;  %v1537_v22 = vld [vmem:[#allocation6 + $0x20] ss:$8 sps:$4 sm:$0xff]   ;;  %v1545_v25 = vld [vmem:[#allocation6 + $0x4] ss:$8 sps:$4 sm:$0xff]  }
  0x4b   :  { %1432 = vset.pattern.permute.xlu0 %v1717_v45  ;;  %753 = vmatpush1.bf16.msra.mxu1 %v1488_v41  ;;  %v1543_v26 = vld [vmem:[#allocation6] ss:$8 sps:$4 sm:$0xff]   ;;  %v128_v35 = vshrl.u32 %v127_v32, 7  ;;  %v125_v39 = vld [vmem:[%s1914_s4] sm:$0x3] }
  0x4c   :  { %286 = vmatpush1.bf16.msra.mxu0 %v1456_v23  ;;  %467 = vperm.xlu0 %1432, %v1800_v17   ;;  %v1542_v23 = vld [vmem:[#allocation6 + $0x14] ss:$8 sps:$4 sm:$0xff]   ;;  %v1301_v41 = vld [vmem:[%s1913_s3 + $0x1] ss:$8 sm:$0x3] }
  0x4d   :  { %287 = vmatprep.subr.bf16.mxu0 %v1457_v24  ;;  %754 = vmatprep.subr.bf16.mxu1 %v1489_v53  ;;  %v1540_v24 = vld [vmem:[#allocation6 + $0x10] ss:$8 sps:$4 sm:$0xff]   ;;  %v1305_v53 = vld [vmem:[%s1913_s3 + $0x5] ss:$8 sm:$0x3] }
  0x4e   :  { %442 = vperm.xlu1 %1431, %v1806_v19  }
  0x4f   :  { %755 = vmatpush1.bf16.msra.mxu1 %v1491_v54  ;;  %v1306_v54 = vld [vmem:[%s1913_s3 + $0x6] ss:$8 sm:$0x3] }
  0x50   :  { %288 = vmatpush1.bf16.msra.mxu0 %v1459_v27  ;;  %1435 = vset.pattern.permute.xlu0 %v1718_v48 }
  0x51   :  { %1299 = vmatprep.subr.msk.bf16.mxu0 %vm266_vm1, %v1298_v30  ;;  %500 = vperm.xlu0 %1435, %v1806_v19  }
  0x52   :  { %1433 = vset.pattern.permute.xlu1 %v1717_v45  ;;  %756 = vmatprep.subr.bf16.mxu1 %v1492_v55  ;;  %v1303_v45 = vld [vmem:[%s1913_s3 + $0x3] ss:$8 sm:$0x3] }
  0x53   :  { %471 = vperm.xlu1 %1433, %v1806_v19   ;;  %757 = vmatpush1.bf16.msra.mxu1 %v1494_v56  ;;  %v1536_v19 = vld [vmem:[#allocation6 + $0x34] ss:$8 sps:$4 sm:$0xff]  }
  0x54   :  { %296 = vmatpush2.bf16.msra.mxu0 %v268_v37  ;;  %758 = vmatprep.subr.bf16.mxu1 %v1495_v57  ;;  %v1833_v37 = vsub.s32 0, %v128_v35 }
  0x55   :  { %297 = vmatprep.subr.bf16.mxu0 %v1462_v34 }
  0x56   :  { %v420_v57 = vrot.slane %v1303_v45, %v1833_v37 }
  0x57   :  { %1434 = vset.pattern.permute.xlu1 %v1718_v48  ;;  %759 = vmatpush1.bf16.msra.mxu1 %v1497_v58  ;;  %v1304_v48 = vld [vmem:[%s1913_s3 + $0x4] ss:$8 sm:$0x3] }
  0x58   :  { %298 = vmatpush2.bf16.msra.mxu0 %v1464_v38  ;;  %496 = vperm.xlu1 %1434, %v1800_v17   ;;  %v1533_v17 = vld [vmem:[#allocation6 + $0x44] ss:$8 sps:$4 sm:$0xff]   ;;  %v318_v38 = vld [vmem:[%s1913_s3] ss:$8 sm:$0x3] }
  0x59   :  { %299 = vmatprep.subr.bf16.mxu0 %v1465_v40  ;;  %760 = vmatprep.subr.bf16.mxu1 %v1498_v59  ;;  %v1841_v40 = vsub.s32 1, %v128_v35 }
  0x5b   :  { %761 = vmatpush2.bf16.msra.mxu1 %v1500_v60  ;;  %v337_v50 = vrot.slane %v318_v38, %v1841_v40  ;;  %v134_v51 = vrot.slane %v125_v39, %v1841_v40  ;;  %v424_v58 = vrot.slane %v1303_v45, %v1841_v40 }
  0x5c   :  { %300 = vmatpush2.bf16.msra.mxu0 %v1467_v43  ;;  %762 = vmatprep.subr.bf16.mxu1 %v1501_v61  ;;  %v333_v43 = vrot.slane %v318_v38, %v1833_v37  ;;  %v449_v61 = vrot.slane %v1304_v48, %v1833_v37 }
  0x5d   :  { %301 = vmatprep.subr.bf16.mxu0 %v1468_v44  ;;  %v1302_v44 = vld [vmem:[%s1913_s3 + $0x2] ss:$8 sm:$0x3] }
  0x5e   :  { %v391_v55 = vrot.slane %v1302_v44, %v1833_v37  ;;  %v395_v56 = vrot.slane %v1302_v44, %v1841_v40 }
  0x5f   :  { %763 = vmatpush2.bf16.msra.mxu1 %v1503_v62  ;;  %v453_v62 = vrot.slane %v1304_v48, %v1841_v40 }
  0x60   :  { %302 = vmatpush2.bf16.msra.mxu0 %v1470_v46  ;;  %764 = vmatprep.subr.bf16.mxu1 %v1504_v63  ;;  %v130_v46 = vrot.slane %v125_v39, %v1833_v37 }
  0x61   :  { %303 = vmatprep.subr.bf16.mxu0 %v1471_v47  ;;  %v362_v47 = vrot.slane %v1301_v41, %v1833_v37 }
  0x63   :  { %765 = vmatpush2.bf16.msra.mxu1 %v1506_v0 }
  0x64   :  { %304 = vmatpush2.bf16.msra.mxu0 %v1473_v49  ;;  %766 = vmatprep.subr.bf16.mxu1 %v1507_v1  ;;  %v366_v49 = vrot.slane %v1301_v41, %v1841_v40 }
  0x65   :  { %1009 = vmatprep.subr.bf16.mxu0 %v1524_v12 }
  0x67   :  { %306 = vmatmul.mubr.bf16.vlgmr.msra.gmra.mxu0 %v98_v52  ;;  %767 = vmatpush2.bf16.msra.mxu1 %v1509_v2 }
  0x68   :  { %768 = vmatprep.subr.bf16.mxu1 %v1510_v3  ;;  %1010 = vmatpush1.bf16.msra.mxu0 %v1522_v11  ;;  %v478_v3 = vrot.slane %v1305_v53, %v1833_v37 }
  0x69   :  { %1011 = vmatprep.subr.bf16.mxu0 %v1527_v13 }
  0x6b   :  { %769 = vmatpush2.bf16.msra.mxu1 %v1512_v4  ;;  %v482_v4 = vrot.slane %v1305_v53, %v1841_v40 }
  0x6c   :  { %770 = vmatprep.subr.bf16.mxu1 %v1513_v5  ;;  %1012 = vmatpush1.bf16.msra.mxu0 %v1525_v14  ;;  %v507_v5 = vrot.slane %v1306_v54, %v1833_v37  ;;  %v511_v14 = vrot.slane %v1306_v54, %v1841_v40 }
  0x6d   :  { %1013 = vmatprep.subr.bf16.mxu0 %v1530_v15 }
  0x6f   :  { %771 = vmatpush2.bf16.msra.mxu1 %v1515_v6 }
  0x70   :  { %772 = vmatprep.subr.bf16.mxu1 %v1516_v7  ;;  %1014 = vmatpush1.bf16.msra.mxu0 %v1528_v16 }
  0x71   :  { %1015 = vmatprep.subr.bf16.mxu0 %v1533_v17 }
  0x73   :  { %773 = vmatpush2.bf16.msra.mxu1 %v1518_v8 }
  0x74   :  { %774 = vmatprep.subr.bf16.mxu1 %v1519_v9  ;;  %1016 = vmatpush1.bf16.msra.mxu0 %v1531_v18 }
  0x75   :  { %1017 = vmatprep.subr.bf16.mxu0 %v1536_v19 }
  0x77   :  { %775 = vmatpush2.bf16.msra.mxu1 %v1521_v10 }
  0x78   :  { %1018 = vmatpush1.bf16.msra.mxu0 %v1534_v20 }
  0x79   :  { %1019 = vmatprep.subr.bf16.mxu0 %v1539_v21 }
  0x7c   :  { %1020 = vmatpush1.bf16.msra.mxu0 %v1537_v22 }
  0x7d   :  { %1021 = vmatprep.subr.bf16.mxu0 %v1542_v23 }
  0x80   :  { %1022 = vmatpush1.bf16.msra.mxu0 %v1540_v24 }
  0x81   :  { %1023 = vmatprep.subr.bf16.mxu0 %v1545_v25 }
  0x84   :  { %1024 = vmatpush1.bf16.msra.mxu0 %v1543_v26 }
  0xb2   :  { %v352_v27 = vpop.permute.xlu1 %351  ;;  %v322_v30 = vpop.permute.xlu0 %321 }
  0xb3   :  { %v340_v60 = vmul.f32 %v333_v43, %v322_v30  ;;  %v369_v1 = vmul.f32 %v362_v47, %v352_v27  ;;  %v341_v6 = vmul.f32 %v337_v50, %v322_v30  ;;  %v370_v10 = vmul.f32 %v366_v49, %v352_v27 }
  0xb6   :  { %v356_v28 = vpop.permute.xlu1 %355  ;;  %v327_v33 = vpop.permute.xlu0 %326 }
  0xb7   :  { %v371_v11 = vmul.f32 %v362_v47, %v356_v28  ;;  %v372_v12 = vmul.f32 %v366_v49, %v356_v28  ;;  %v342_v15 = vmul.f32 %v333_v43, %v327_v33  ;;  %v343_v21 = vmul.f32 %v337_v50, %v327_v33 }
  0xbb   :  { %v1827_v29 = vpop.permute.xlu1 %384 }
  0xbc   :  { %v381_v36 = vpop.permute.xlu0 %380  ;;  %v400_v20 = vmul.f32 %v391_v55, %v1827_v29  ;;  %v401_v32 = vmul.f32 %v395_v56, %v1827_v29 }
  0xbd   :  { %v398_v8 = vmul.f32 %v391_v55, %v381_v36  ;;  %v399_v23 = vmul.f32 %v395_v56, %v381_v36 }
  0xc0   :  { %v1829_v31 = vpop.permute.xlu1 %409 }
  0xc1   :  { %v427_v22 = vmul.f32 %v420_v57, %v1829_v31  ;;  %v428_v35 = vmul.f32 %v424_v58, %v1829_v31 }
  0xc2   :  { %v414_v52 = vpop.permute.xlu0 %413 }
  0xc3   :  { %v429_v36 = vmul.f32 %v420_v57, %v414_v52  ;;  %v430_v31 = vmul.f32 %v424_v58, %v414_v52 }
  0xc5   :  { %v1831_v34 = vpop.permute.xlu1 %438 }
  0xc6   :  { %v456_v38 = vmul.f32 %v449_v61, %v1831_v34  ;;  %v457_v45 = vmul.f32 %v453_v62, %v1831_v34 }
  0xc7   :  { %v468_v19 = vpop.permute.xlu0 %467 }
  0xc8   :  { %v485_v39 = vmul.f32 %v478_v3, %v468_v19 }
  0xc9   :  { %v1846_v42 = vpop.permute.xlu1 %442 }
  0xca   :  { %v458_v29 = vmul.f32 %v449_v61, %v1846_v42  ;;  %v459_v34 = vmul.f32 %v453_v62, %v1846_v42 }
  0xcc   :  { %v501_v53 = vpop.permute.xlu0 %500 }
  0xcd   :  { %v516_v57 = vmul.f32 %v507_v5, %v501_v53 }
  0xce   :  { %v1875_v0 = vpop.permute.xlu1 %471 }
  0xcf   :  { %v487_v54 = vmul.f32 %v478_v3, %v1875_v0 }
  0xd3   :  { %v497_v28 = vpop.permute.xlu1 %496 }
  0xd4   :  { %v514_v47 = vmul.f32 %v507_v5, %v497_v28  ;;  %v515_v55 = vmul.f32 %v511_v14, %v497_v28  ;;  %v1554_v28 = vld [vmem:[#allocation6 + $0xd4] ss:$8 sps:$4 sm:$0xff]  }
 0x127   :  { %v307_v59 = vpop.f32.mrf.mxu0 }
 0x128   :  { %v308_v63 = vadd.f32 %v307_v59, %v130_v46 }
 0x129   :  { %v309_v2 = vpop.f32.mrf.mxu0 }
 0x12a   :  { %v344_v7 = vadd.f32 %v340_v60, %v308_v63  ;;  %v310_v9 = vadd.f32 %v309_v2, %v134_v51 }
 0x12b   :  { %v311_v13 = vpop.f32.mrf.mxu0 }
 0x12c   :  { %v373_v16 = vadd.f32 %v369_v1, %v344_v7  ;;  %v345_v17 = vadd.f32 %v341_v6, %v310_v9  ;;  %v312_v18 = vadd.f32 %v311_v13, %v130_v46  ;;  %v486_v46 = vmul.f32 %v482_v4, %v468_v19 }
 0x12d   :  { %v313_v24 = vpop.f32.mrf.mxu0 }
 0x12e   :  { %v402_v25 = vadd.f32 %v398_v8, %v373_v16  ;;  %v374_v26 = vadd.f32 %v370_v10, %v345_v17  ;;  %v346_v27 = vadd.f32 %v342_v15, %v312_v18  ;;  %v314_v30 = vadd.f32 %v313_v24, %v134_v51 }
 0x12f   :  { %v517_v8 = vmul.f32 %v511_v14, %v501_v53  ;;  %v488_v10 = vmul.f32 %v482_v4, %v1875_v0 }
 0x130   :  { %v431_v41 = vadd.f32 %v427_v22, %v402_v25  ;;  %v403_v43 = vadd.f32 %v399_v23, %v374_v26  ;;  %v375_v44 = vadd.f32 %v371_v11, %v346_v27  ;;  %v347_v33 = vadd.f32 %v343_v21, %v314_v30  ;;  %v1548_v25 = vld [vmem:[#allocation6 + $0xf4] ss:$8 sps:$4 sm:$0xff]   ;;  %v1546_v26 = vld [vmem:[#allocation6 + $0xf0] ss:$8 sps:$4 sm:$0xff]   ;;  %v1551_v27 = vld [vmem:[#allocation6 + $0xe4] ss:$8 sps:$4 sm:$0xff]  }
 0x131   :  { %1025 = vmatprep.subr.bf16.mxu0 %v1548_v25  ;;  %v1549_v30 = vld [vmem:[#allocation6 + $0xe0] ss:$8 sps:$4 sm:$0xff]  }
 0x132   :  { %v404_v48 = vadd.f32 %v400_v20, %v375_v44  ;;  %v376_v49 = vadd.f32 %v372_v12, %v347_v33  ;;  %v432_v50 = vadd.f32 %v428_v35, %v403_v43  ;;  %v460_v51 = vadd.f32 %v456_v38, %v431_v41  ;;  %1026 = vmatpush2.bf16.msra.mxu0 %v1546_v26  ;;  %v1557_v35 = vld [vmem:[#allocation6 + $0xc4] ss:$8 sps:$4 sm:$0xff]   ;;  %v1555_v38 = vld [vmem:[#allocation6 + $0xc0] ss:$8 sps:$4 sm:$0xff]   ;;  %v1558_v41 = vld [vmem:[#allocation6 + $0xb0] ss:$8 sps:$4 sm:$0xff]  }
 0x133   :  { %1027 = vmatprep.subr.bf16.mxu0 %v1551_v27  ;;  %v1563_v43 = vld [vmem:[#allocation6 + $0xa4] ss:$8 sps:$4 sm:$0xff]   ;;  %v1561_v44 = vld [vmem:[#allocation6 + $0xa0] ss:$8 sps:$4 sm:$0xff]   ;;  %v1566_v33 = vld [vmem:[#allocation6 + $0x94] ss:$8 sps:$4 sm:$0xff]  }
 0x134   :  { %v433_v56 = vadd.f32 %v429_v36, %v404_v48  ;;  %v405_v59 = vadd.f32 %v401_v32, %v376_v49  ;;  %v461_v60 = vadd.f32 %v457_v45, %v432_v50  ;;  %v489_v63 = vadd.f32 %v485_v39, %v460_v51  ;;  %v1552_v32 = vld [vmem:[#allocation6 + $0xd0] ss:$8 sps:$4 sm:$0xff]   ;;  %v1560_v39 = vld [vmem:[#allocation6 + $0xb4] ss:$8 sps:$4 sm:$0xff]   ;;  %v1569_v36 = vld [vmem:[#allocation6 + $0x84] ss:$8 sps:$4 sm:$0xff]  }
 0x135   :  { %v1564_v45 = vld [vmem:[#allocation6 + $0x90] ss:$8 sps:$4 sm:$0xff]  }
 0x136   :  { %v434_v1 = vadd.f32 %v430_v31, %v405_v59  ;;  %v462_v2 = vadd.f32 %v458_v29, %v433_v56  ;;  %v490_v6 = vadd.f32 %v486_v46, %v461_v60  ;;  %v518_v7 = vadd.f32 %v514_v47, %v489_v63  ;;  %1028 = vmatpush2.bf16.msra.mxu0 %v1549_v30  ;;  %v1567_v46 = vld [vmem:[#allocation6 + $0x80] ss:$8 sps:$4 sm:$0xff]   ;;  %v572_v47 = vld [vmem:[%s1916_s6] sm:$0x3] }
 0x137   :  { %1029 = vmatprep.subr.bf16.mxu0 %v1554_v28  ;;  %v577_v48 = vrot.slane %v572_v47, %v1833_v37  ;;  %v581_v49 = vrot.slane %v572_v47, %v1841_v40 }
 0x138   :  { %v463_v9 = vadd.f32 %v459_v34, %v434_v1  ;;  %v491_v61 = vadd.f32 %v487_v54, %v462_v2  ;;  %v519_v52 = vadd.f32 %v515_v55, %v490_v6  ;;  %v522_v58 = vmul.f32 0.5, %v518_v7 }
 0x13a   :  { %v492_v3 = vadd.f32 %v488_v10, %v463_v9  ;;  %v523_v11 = vmul.f32 0.5, %v519_v52  ;;  %v520_v12 = vadd.f32 %v516_v57, %v491_v61  ;;  %1030 = vmatpush2.bf16.msra.mxu0 %v1552_v32 }
 0x13b   :  { %1031 = vmatprep.subr.bf16.mxu0 %v1557_v35 }
 0x13c   :  { %1586 = vtanh.f32 %v523_v11  ;;  %v521_v13 = vadd.f32 %v517_v8, %v492_v3  ;;  %v524_v15 = vmul.f32 0.5, %v520_v12 }
 0x13d   :  { %1588 = vtanh.f32 %v522_v58 }
 0x13e   :  { %v525_v42 = vmul.f32 0.5, %v521_v13  ;;  %1590 = vtanh.f32 %v524_v15  ;;  %1032 = vmatpush2.bf16.msra.mxu0 %v1555_v38  ;;  %v1570_v13 = vld [vmem:[#allocation7 + $0x78] sm:$0xff]  }
 0x13f   :  { %1033 = vmatprep.subr.bf16.mxu0 %v1560_v39  ;;  %v1571_v15 = vld [vmem:[#allocation7 + $0x38] sm:$0xff]   ;;  %1388 = vmatprep.subr.bf16.mxu1 %v1570_v13 }
 0x140   :  { %1592 = vtanh.f32 %v525_v42  ;;  %v1572_v42 = vld [vmem:[#allocation7 + $0x70] sm:$0xff]  }
 0x142   :  { %1034 = vmatpush2.bf16.msra.mxu0 %v1558_v41 }
 0x143   :  { %1035 = vmatprep.subr.bf16.mxu0 %v1563_v43 }
 0x146   :  { %1036 = vmatpush2.bf16.msra.mxu0 %v1561_v44 }
 0x147   :  { %1037 = vmatprep.subr.bf16.mxu0 %v1566_v33 }
 0x149   :  { %v1587_v62 = vpop.eup %1586 }
 0x14a   :  { %v1589_v5 = vpop.eup %1588  ;;  %v531_v14 = vmul.f32 0.5, %v1587_v62  ;;  %1038 = vmatpush2.bf16.msra.mxu0 %v1564_v45  ;;  %v1573_v62 = vld [vmem:[#allocation7 + $0x30] sm:$0xff]  }
 0x14b   :  { %v1591_v16 = vpop.eup %1590  ;;  %v530_v0 = vmul.f32 0.5, %v1589_v5  ;;  %1039 = vmatprep.subr.bf16.mxu0 %v1569_v36  ;;  %v1574_v5 = vld [vmem:[#allocation7 + $0x68] sm:$0xff]  }
 0x14c   :  { %v532_v17 = vmul.f32 0.5, %v1591_v16  ;;  %v535_v20 = vadd.f32 0.5, %v531_v14  ;;  %v1575_v16 = vld [vmem:[#allocation7 + $0x28] sm:$0xff]   ;;  %v1576_v14 = vld [vmem:[#allocation7 + $0x60] sm:$0xff]  }
 0x14d   :  { %v1593_v18 = vpop.eup %1592  ;;  %v534_v22 = vadd.f32 0.5, %v530_v0  ;;  %v1579_v0 = vld [vmem:[#allocation7 + $0x18] sm:$0xff]  }
 0x14e   :  { %v533_v4 = vmul.f32 0.5, %v1593_v18  ;;  %v536_v19 = vadd.f32 0.5, %v532_v17  ;;  %1040 = vmatpush2.bf16.msra.mxu0 %v1567_v46  ;;  %v1577_v17 = vld [vmem:[#allocation7 + $0x20] sm:$0xff]   ;;  %v1578_v18 = vld [vmem:[#allocation7 + $0x58] sm:$0xff]  }
 0x150   :  { %v537_v21 = vadd.f32 0.5, %v533_v4  ;;  %v538_v24 = vpack.c.bf16 %v536_v19, %v534_v22  ;;  %v1580_v4 = vld [vmem:[#allocation7 + $0x50] sm:$0xff]   ;;  %v1584_v22 = vld [vmem:[#allocation7 + $0x40] sm:$0xff]  }
 0x151   :  { %v1581_v19 = vld [vmem:[#allocation7 + $0x10] sm:$0xff]  }
 0x152   :  { %v539_v23 = vpack.c.bf16 %v537_v21, %v535_v20  ;;  %v1582_v20 = vld [vmem:[#allocation7 + $0x48] sm:$0xff]  }
 0x153   :  { %v1583_v21 = vld [vmem:[#allocation7 + $0x8] sm:$0xff]  }
 0x154   :  { %776 = vmatprep.mubr.bf16.mxu1 %v539_v23  ;;  %v1585_v23 = vld [vmem:[#allocation7] sm:$0xff]  }
 0x155   :  { %777 = vmatmul.mubr.bf16.vlgmr.msra.gmra.mxu1 %v538_v24  ;;  %v837_v24 = vld [vmem:[%s1918_s8] sm:$0x3] }
 0x156   :  { %1389 = vmatpush3.bf16.msra.mxu1 %v1571_v15  ;;  %v842_v25 = vrot.slane %v837_v24, %v1833_v37  ;;  %v846_v26 = vrot.slane %v837_v24, %v1841_v40 }
 0x157   :  { %1390 = vmatprep.subr.bf16.mxu1 %v1572_v42 }
 0x15a   :  { %1391 = vmatpush3.bf16.msra.mxu1 %v1573_v62 }
 0x15b   :  { %1392 = vmatprep.subr.bf16.mxu1 %v1574_v5 }
 0x15e   :  { %1393 = vmatpush3.bf16.msra.mxu1 %v1575_v16 }
 0x15f   :  { %1394 = vmatprep.subr.bf16.mxu1 %v1576_v14 }
 0x162   :  { %1395 = vmatpush3.bf16.msra.mxu1 %v1577_v17 }
 0x163   :  { %1396 = vmatprep.subr.bf16.mxu1 %v1578_v18 }
 0x166   :  { %1397 = vmatpush3.bf16.msra.mxu1 %v1579_v0 }
 0x167   :  { %1398 = vmatprep.subr.bf16.mxu1 %v1580_v4 }
 0x16a   :  { %1399 = vmatpush3.bf16.msra.mxu1 %v1581_v19 }
 0x16b   :  { %1400 = vmatprep.subr.bf16.mxu1 %v1582_v20 }
 0x16e   :  { %1401 = vmatpush3.bf16.msra.mxu1 %v1583_v21 }
 0x16f   :  { %1402 = vmatprep.subr.bf16.mxu1 %v1584_v22 }
 0x172   :  { %1403 = vmatpush3.bf16.msra.mxu1 %v1585_v23 }
 0x215   :  { %v778_v50 = vpop.f32.mrf.mxu1 }
 0x216   :  { %v779_v51 = vadd.f32 %v778_v50, %v577_v48 }
 0x217   :  { %v780_v53 = vpop.f32.mrf.mxu1 }
 0x218   :  { %v781_v29 = vadd.f32 %v780_v53, %v581_v49  ;;  %v787_v31 = vmul.f32 0.5, %v779_v51 }
 0x219   :  { %v782_v54 = vpop.f32.mrf.mxu1 }
 0x21a   :  { %v788_v55 = vmul.f32 0.5, %v781_v29  ;;  %v783_v56 = vadd.f32 %v782_v54, %v577_v48 }
 0x21b   :  { %v784_v59 = vpop.f32.mrf.mxu1 }
 0x21c   :  { %1594 = vtanh.f32 %v788_v55  ;;  %v789_v60 = vmul.f32 0.5, %v783_v56  ;;  %v785_v63 = vadd.f32 %v784_v59, %v581_v49 }
 0x21d   :  { %1596 = vtanh.f32 %v787_v31 }
 0x21e   :  { %1598 = vtanh.f32 %v789_v60  ;;  %v790_v34 = vmul.f32 0.5, %v785_v63  ;;  %v1371_v60 = vld [vmem:[%s1920_s10] ss:$0 sm:$0xff] }
 0x220   :  { %1600 = vtanh.f32 %v790_v34 }
 0x229   :  { %v1595_v57 = vpop.eup %1594 }
 0x22a   :  { %v1597_v1 = vpop.eup %1596  ;;  %v796_v6 = vmul.f32 0.5, %v1595_v57 }
 0x22b   :  { %v1599_v2 = vpop.eup %1598  ;;  %v795_v9 = vmul.f32 0.5, %v1597_v1 }
 0x22c   :  { %v797_v7 = vmul.f32 0.5, %v1599_v2  ;;  %v800_v52 = vadd.f32 0.5, %v796_v6 }
 0x22d   :  { %v1601_v8 = vpop.eup %1600  ;;  %v799_v3 = vadd.f32 0.5, %v795_v9 }
 0x22e   :  { %v798_v10 = vmul.f32 0.5, %v1601_v8  ;;  %v801_v61 = vadd.f32 0.5, %v797_v7 }
 0x230   :  { %v802_v58 = vadd.f32 0.5, %v798_v10  ;;  %v803_v12 = vpack.c.bf16 %v801_v61, %v799_v3 }
 0x232   :  { %v804_v11 = vpack.c.bf16 %v802_v58, %v800_v52 }
 0x234   :  { %1041 = vmatprep.mubr.bf16.mxu0 %v804_v11 }
 0x235   :  { %1042 = vmatmul.mubr.bf16.vlgmr.msra.gmra.mxu0 %v803_v12 }
 0x2f5   :  { %v1043_v27 = vpop.f32.mrf.mxu0 }
 0x2f6   :  { %v1044_v30 = vadd.f32 %v1043_v27, %v842_v25 }
 0x2f7   :  { %v1045_v28 = vpop.f32.mrf.mxu0 }
 0x2f8   :  { %v1046_v32 = vadd.f32 %v1045_v28, %v846_v26  ;;  %v1052_v35 = vmul.f32 0.5, %v1044_v30 }
 0x2f9   :  { %v1047_v38 = vpop.f32.mrf.mxu0 }
 0x2fa   :  { %v1053_v39 = vmul.f32 0.5, %v1046_v32  ;;  %v1048_v41 = vadd.f32 %v1047_v38, %v842_v25 }
 0x2fb   :  { %v1049_v43 = vpop.f32.mrf.mxu0 }
 0x2fc   :  { %1602 = vtanh.f32 %v1053_v39  ;;  %v1054_v44 = vmul.f32 0.5, %v1048_v41  ;;  %v1050_v33 = vadd.f32 %v1049_v43, %v846_v26 }
 0x2fd   :  { %1604 = vtanh.f32 %v1052_v35 }
 0x2fe   :  { %1606 = vtanh.f32 %v1054_v44  ;;  %v1055_v45 = vmul.f32 0.5, %v1050_v33 }
 0x300   :  { %1608 = vtanh.f32 %v1055_v45 }
 0x309   :  { %v1603_v36 = vpop.eup %1602 }
 0x30a   :  { %v1605_v37 = vpop.eup %1604  ;;  %v1061_v40 = vmul.f32 0.5, %v1603_v36 }
 0x30b   :  { %v1607_v46 = vpop.eup %1606  ;;  %v1060_v49 = vmul.f32 0.5, %v1605_v37 }
 0x30c   :  { %v1062_v47 = vmul.f32 0.5, %v1607_v46  ;;  %v1065_v53 = vadd.f32 0.5, %v1061_v40 }
 0x30d   :  { %v1609_v48 = vpop.eup %1608  ;;  %v1064_v31 = vadd.f32 0.5, %v1060_v49 }
 0x30e   :  { %v1063_v50 = vmul.f32 0.5, %v1609_v48  ;;  %v1066_v51 = vadd.f32 0.5, %v1062_v47 }
 0x310   :  { %v1067_v29 = vadd.f32 0.5, %v1063_v50  ;;  %v1068_v55 = vpack.c.bf16 %v1066_v51, %v1064_v31 }
 0x312   :  { %v1069_v54 = vpack.c.bf16 %v1067_v29, %v1065_v53 }
 0x314   :  { %1237 = vmatprep.mubr.bf16.mxu1 %v1069_v54 }
 0x315   :  { %1238 = vmatmul.mubr.bf16.vlgmr.msra.gmra.mxu1 %v1068_v55 }
 0x3d5   :  { %v1404_v56 = vpop.f32.mrf.mxu1 }
 0x3d7   :  { %v1405_v59 = vpop.f32.mrf.mxu1 }
 0x3d8   :  { %v1406_v63 = vadd.f32 %v1405_v59, %v1404_v56 }
 0x3d9   :  { %v1407_v34 = vpop.f32.mrf.mxu1 }
 0x3da   :  { %v1240_v57 = vadd.f32 %v1406_v63, %v1371_v60 }
 0x3db   :  { %v1408_v1 = vpop.f32.mrf.mxu1 }
 0x3dc   :  { %v1409_v2 = vadd.f32 %v1408_v1, %v1407_v34  ;;  %1246 = vmax.xlane.f32.xlu1 %v1240_v57 }
 0x3de   :  { %v1243_v6 = vadd.f32 %v1409_v2, %v1371_v60 }
 0x3e0   :  { %1248 = vmax.xlane.f32.xlu0 %v1243_v6 }
 0x465   :  { %v1247_v7 = vpop.xlane.xlu1 %1246 }
 0x466   :  { %v1250_v8 = vsub.f32 %v1240_v57, %v1247_v7 }
 0x468   :  { %v1252_v9 = vmul.f32 1.442695, %v1250_v8 }
 0x469   :  { %v1249_v10 = vpop.xlane.xlu0 %1248 }
 0x46a   :  { %1610 = vpow2.f32 %v1252_v9  ;;  %v1251_v61 = vsub.f32 %v1243_v6, %v1249_v10 }
 0x46c   :  { %v1254_v52 = vmul.f32 1.442695, %v1251_v61 }
 0x46e   :  { %1612 = vpow2.f32 %v1254_v52 }
 0x477   :  { %v1611_v58 = vpop.eup %1610 }
 0x478   :  { %1256 = vadd.xlane.f32.xlu1 %v1611_v58 }
 0x47b   :  { %v1613_v3 = vpop.eup %1612 }
 0x47c   :  { %1258 = vadd.xlane.f32.xlu0 %v1613_v3 }
 0x501   :  { %v1257_v11 = vpop.xlane.xlu1 %1256 }
 0x502   :  { %1614 = vrcp.f32 %v1257_v11 }
 0x505   :  { %v1259_v12 = vpop.xlane.xlu0 %1258 }
 0x506   :  { %1616 = vrcp.f32 %v1259_v12 }
 0x50f   :  { %v1615_v13 = vpop.eup %1614 }
 0x510   :  { %v1261_v15 = vmul.f32 %v1615_v13, %v1611_v58 }
 0x512   :  { %1264 = vst [vmem:[%s1921_s11] sm:$0xff] %v1261_v15 }
 0x513   :  { %v1617_v42 = vpop.eup %1616 }
 0x514   :  { %v1263_v62 = vmul.f32 %v1617_v42, %v1613_v3 }
 0x516   :  { %1265 = vst [vmem:[%s1921_s11 + $0x8] sm:$0xff] %v1263_v62 }
 0x517   :  { %1270 = vsyncpa [#allocation3], 1 }
 0x518   :  { %1271 = vsyncpa [#allocation5], 1 }
 0x519   :  { %1272 = vsyncpa [#allocation8], 1 }

</bundles_post_ra>
